<compile_context>
chip_gen: v7x
topology: tpu7x:2x2x1
jax: 0.10.0
libtpu: 0.0.40
codegen_flags: <defaults>
</compile_context>

<pallas_src>
import functools

import jax
import jax.numpy as jnp
import numpy as np
from jax.experimental import pallas as pl
from jax.experimental.pallas import tpu as pltpu


# ----------------------------------------------------------------------------
# Pallas kernel: SEAttention forward for one block of Bt images
# ----------------------------------------------------------------------------
def se_attention_kernel(x_ref, w1_ref, w2_ref, out_ref, pooled_ref, *, hw_inv):
    # x_ref     : (Bt, C, HW)  block of images; channels -> sublanes, HW -> lanes
    # w1_ref    : (Cr, C)      fc[0].weight  (PyTorch (out, in) layout)
    # w2_ref    : (C, Cr)      fc[2].weight
    # out_ref   : (Bt, C, HW)
    # pooled_ref: (C, Bt)      VMEM scratch for the squeeze vectors
    bt = x_ref.shape[0]

    # --- Squeeze: global average pool, one image at a time (short live ranges).
    for b in range(bt):
        xb = x_ref[b].astype(jnp.float32)                               # (C, HW)
        pooled_ref[:, b:b + 1] = jnp.sum(xb, axis=-1, keepdims=True) * hw_inv

    # --- Excite: one batched MLP for the whole block (real MXU matmuls).
    h = jnp.dot(w1_ref[...], pooled_ref[...],
                preferred_element_type=jnp.float32)                     # (Cr, Bt)
    h = jnp.maximum(h, 0.0)                                             # ReLU
    y = jnp.dot(w2_ref[...], h, preferred_element_type=jnp.float32)     # (C, Bt)
    y = 1.0 / (1.0 + jnp.exp(-y))                                       # exact sigmoid

    # --- Rescale: re-read x from VMEM per image and stream the stores.
    for b in range(bt):
        scale = y[:, b:b + 1]                                           # (C, 1)
        out_ref[b] = (x_ref[b].astype(jnp.float32) * scale).astype(out_ref.dtype)


# ----------------------------------------------------------------------------
# Block-batch chooser: ~2 MiB blocks, divisor of B (keeps VMEM use safe on
# every generation and amortizes per-grid-step overhead).
# ----------------------------------------------------------------------------
def _choose_block_batch(B, C, HW, itemsize, target_bytes=2 << 20, max_bt=16):
    per_image = C * HW * itemsize
    bt = int(max(1, min(max_bt, target_bytes // max(per_image, 1), B)))
    while B % bt:          # keep the grid exact (no ragged last block)
        bt -= 1
    return bt


# ----------------------------------------------------------------------------
# Wrapper (glue: flatten spatial dims, pallas_call setup)
# ----------------------------------------------------------------------------
def se_attention(x_nchw, w1, w2, *, block_batch=None):
    B, C, H, W = x_nchw.shape
    HW = H * W
    Cr = w1.shape[0]
    x2 = x_nchw.reshape(B, C, HW)            # free view: NCHW is contiguous

    bt = block_batch or _choose_block_batch(B, C, HW, x_nchw.dtype.itemsize)
    grid = (B // bt,)

    kernel = functools.partial(se_attention_kernel, hw_inv=1.0 / HW)
    out = pl.pallas_call(
        kernel,
        out_shape=jax.ShapeDtypeStruct((B, C, HW), x_nchw.dtype),
        grid=grid,
        in_specs=[
            pl.BlockSpec((bt, C, HW), lambda i: (i, 0, 0)),
            # Weights: constant index_map -> stay resident in VMEM across steps.
            pl.BlockSpec((Cr, C), lambda i: (0, 0)),
            pl.BlockSpec((C, Cr), lambda i: (0, 0)),
        ],
        out_specs=pl.BlockSpec((bt, C, HW), lambda i: (i, 0, 0)),
        scratch_shapes=[pltpu.VMEM((C, bt), jnp.float32)],
        compiler_params=pltpu.CompilerParams(
            dimension_semantics=("parallel",),   # shard batch blocks across TCs (v7x)
        ),
    )(x2, w1, w2)
    return out.reshape(B, C, H, W)


# ----------------------------------------------------------------------------
# Pure-JAX reference (for correctness check)
# ----------------------------------------------------------------------------
def ref_forward(x, w1, w2):
    pooled = jnp.mean(x, axis=(2, 3))                    # (B, C)
    h = jax.nn.relu(pooled @ w1.T)                       # (B, C//r)
    y = jax.nn.sigmoid(h @ w2.T)                         # (B, C)
    return x * y[:, :, None, None]


# ----------------------------------------------------------------------------
if __name__ == "__main__":
    key = jax.random.PRNGKey(0)
    kx, k1, k2 = jax.random.split(key, 3)

    # Small, TPU-friendly config consistent with the module: channel=128,
    # reduction=16 (hidden = 8), batch=2, 16x16 feature map.
    B, C, H, W = 2, 128, 16, 16
    reduction = 16
    Cr = C // reduction

    x = jax.random.normal(kx, (B, C, H, W), jnp.float32)
    # Linear weights in PyTorch (out_features, in_features) layout, bias=False.
    w1 = 0.1 * jax.random.normal(k1, (Cr, C), jnp.float32)   # fc[0].weight
    w2 = 0.1 * jax.random.normal(k2, (C, Cr), jnp.float32)   # fc[2].weight

    out = jax.block_until_ready(se_attention(x, w1, w2))
    ref = jax.block_until_ready(ref_forward(x, w1, w2))

    if not np.allclose(np.asarray(out), np.asarray(ref), rtol=1e-4, atol=1e-5):
        raise AssertionError("Pallas SEAttention output mismatch vs JAX reference")

    print("KERNEL_OK")
</pallas_src>

<mosaic_0001>
module attributes {stable_mosaic.version = 11 : i64} {
  func.func @se_attention_kernel(%arg0: i32, %arg1: memref<2x128x256xf32, #tpu.memory_space<vmem>>, %arg2: memref<8x128xf32, #tpu.memory_space<vmem>>, %arg3: memref<128x8xf32, #tpu.memory_space<vmem>>, %arg4: memref<2x128x256xf32, #tpu.memory_space<vmem>>, %arg5: memref<128x2xf32, #tpu.memory_space<vmem>>) attributes {dimension_semantics = [#tpu.dimension_semantics<parallel>], iteration_bounds = array<i64: 1>, scalar_prefetch = 0 : i64, scratch_operands = 1 : i64, tpu.core_type = #tpu.core_type<tc>, window_params = [{transform_indices = @transform_0, window_bounds = array<i64: 2, 128, 256>}, {pipeline_mode = #tpu.pipeline_mode<synchronous>, transform_indices = @transform_1, window_bounds = array<i64: 8, 128>}, {pipeline_mode = #tpu.pipeline_mode<synchronous>, transform_indices = @transform_2, window_bounds = array<i64: 128, 8>}, {transform_indices = @transform_3, window_bounds = array<i64: 2, 128, 256>}]} {
    %c0 = arith.constant 0 : index
    %c0_0 = arith.constant 0 : index
    %c0_1 = arith.constant 0 : index
    %0 = vector.load %arg1[%c0, %c0_0, %c0_1] : memref<2x128x256xf32, #tpu.memory_space<vmem>>, vector<1x128x256xf32>
    %1 = vector.shape_cast %0 : vector<1x128x256xf32> to vector<128x256xf32>
    %cst = arith.constant dense<0.000000e+00> : vector<128xf32>
    %2 = vector.multi_reduction <add>, %1, %cst [1] : vector<128x256xf32> to vector<128xf32>
    %3 = vector.shape_cast %2 : vector<128xf32> to vector<128x1xf32>
    %cst_2 = arith.constant 3.906250e-03 : f32
    %4 = vector.broadcast %cst_2 : f32 to vector<128x1xf32>
    %5 = arith.mulf %3, %4 : vector<128x1xf32>
    %c0_3 = arith.constant 0 : index
    %c0_4 = arith.constant 0 : index
    %6 = vector.load %arg5[%c0_3, %c0_4] : memref<128x2xf32, #tpu.memory_space<vmem>>, vector<128x1xf32>
    tpu.vector_store %arg5[%c0_3, %c0_4], %5 {strides = array<i32>} : memref<128x2xf32, #tpu.memory_space<vmem>>, vector<128x1xf32>,
    %c1 = arith.constant 1 : index
    %c0_5 = arith.constant 0 : index
    %c0_6 = arith.constant 0 : index
    %7 = vector.load %arg1[%c1, %c0_5, %c0_6] : memref<2x128x256xf32, #tpu.memory_space<vmem>>, vector<1x128x256xf32>
    %8 = vector.shape_cast %7 : vector<1x128x256xf32> to vector<128x256xf32>
    %cst_7 = arith.constant dense<0.000000e+00> : vector<128xf32>
    %9 = vector.multi_reduction <add>, %8, %cst_7 [1] : vector<128x256xf32> to vector<128xf32>
    %10 = vector.shape_cast %9 : vector<128xf32> to vector<128x1xf32>
    %cst_8 = arith.constant 3.906250e-03 : f32
    %11 = vector.broadcast %cst_8 : f32 to vector<128x1xf32>
    %12 = arith.mulf %10, %11 : vector<128x1xf32>
    %c0_9 = arith.constant 0 : index
    %c1_10 = arith.constant 1 : index
    %13 = vector.load %arg5[%c0_9, %c1_10] : memref<128x2xf32, #tpu.memory_space<vmem>>, vector<128x1xf32>
    tpu.vector_store %arg5[%c0_9, %c1_10], %12 {strides = array<i32>} : memref<128x2xf32, #tpu.memory_space<vmem>>, vector<128x1xf32>,
    %c0_11 = arith.constant 0 : index
    %c0_12 = arith.constant 0 : index
    %14 = vector.load %arg2[%c0_11, %c0_12] : memref<8x128xf32, #tpu.memory_space<vmem>>, vector<8x128xf32>
    %c0_13 = arith.constant 0 : index
    %c0_14 = arith.constant 0 : index
    %15 = vector.load %arg5[%c0_13, %c0_14] : memref<128x2xf32, #tpu.memory_space<vmem>>, vector<128x2xf32>
    %cst_15 = arith.constant dense<0.000000e+00> : vector<8x2xf32>
    %16 = tpu.matmul %14, %15, %cst_15 {dimension_numbers = #tpu.dot_dimension_numbers<[1], [0], [0], [1], [0, 0, 1, 1], [], []>} : vector<8x128xf32>, vector<128x2xf32>, vector<8x2xf32> -> vector<8x2xf32>
    %cst_16 = arith.constant 0.000000e+00 : f32
    %17 = vector.broadcast %cst_16 : f32 to vector<8x2xf32>
    %18 = arith.maximumf %16, %17 : vector<8x2xf32>
    %c0_17 = arith.constant 0 : index
    %c0_18 = arith.constant 0 : index
    %19 = vector.load %arg3[%c0_17, %c0_18] : memref<128x8xf32, #tpu.memory_space<vmem>>, vector<128x8xf32>
    %cst_19 = arith.constant dense<0.000000e+00> : vector<128x2xf32>
    %20 = tpu.matmul %19, %18, %cst_19 {dimension_numbers = #tpu.dot_dimension_numbers<[1], [0], [0], [1], [0, 0, 1, 1], [], []>} : vector<128x8xf32>, vector<8x2xf32>, vector<128x2xf32> -> vector<128x2xf32>
    %cst_20 = arith.constant 0.000000e+00 : f32
    %21 = vector.broadcast %cst_20 : f32 to vector<128x2xf32>
    %22 = arith.subf %21, %20 : vector<128x2xf32>
    %23 = math.exp %22 : vector<128x2xf32>
    %cst_21 = arith.constant 1.000000e+00 : f32
    %24 = vector.broadcast %cst_21 : f32 to vector<128x2xf32>
    %25 = arith.addf %24, %23 : vector<128x2xf32>
    %cst_22 = arith.constant 1.000000e+00 : f32
    %26 = vector.broadcast %cst_22 : f32 to vector<128x2xf32>
    %27 = arith.divf %26, %25 : vector<128x2xf32>
    %28 = vector.extract_strided_slice %27 {offsets = [0, 0], sizes = [128, 1], strides = [1, 1]} : vector<128x2xf32> to vector<128x1xf32>
    %c0_23 = arith.constant 0 : index
    %c0_24 = arith.constant 0 : index
    %c0_25 = arith.constant 0 : index
    %29 = vector.load %arg1[%c0_23, %c0_24, %c0_25] : memref<2x128x256xf32, #tpu.memory_space<vmem>>, vector<1x128x256xf32>
    %30 = vector.shape_cast %29 : vector<1x128x256xf32> to vector<128x256xf32>
    %31 = vector.broadcast %28 : vector<128x1xf32> to vector<128x256xf32>
    %32 = arith.mulf %30, %31 : vector<128x256xf32>
    %c0_26 = arith.constant 0 : index
    %c0_27 = arith.constant 0 : index
    %c0_28 = arith.constant 0 : index
    %33 = vector.load %arg4[%c0_26, %c0_27, %c0_28] : memref<2x128x256xf32, #tpu.memory_space<vmem>>, vector<1x128x256xf32>
    %34 = vector.shape_cast %33 : vector<1x128x256xf32> to vector<128x256xf32>
    %35 = vector.shape_cast %32 : vector<128x256xf32> to vector<1x128x256xf32>
    tpu.vector_store %arg4[%c0_26, %c0_27, %c0_28], %35 {strides = array<i32>} : memref<2x128x256xf32, #tpu.memory_space<vmem>>, vector<1x128x256xf32>,
    %36 = vector.extract_strided_slice %27 {offsets = [0, 1], sizes = [128, 1], strides = [1, 1]} : vector<128x2xf32> to vector<128x1xf32>
    %c1_29 = arith.constant 1 : index
    %c0_30 = arith.constant 0 : index
    %c0_31 = arith.constant 0 : index
    %37 = vector.load %arg1[%c1_29, %c0_30, %c0_31] : memref<2x128x256xf32, #tpu.memory_space<vmem>>, vector<1x128x256xf32>
    %38 = vector.shape_cast %37 : vector<1x128x256xf32> to vector<128x256xf32>
    %39 = vector.broadcast %36 : vector<128x1xf32> to vector<128x256xf32>
    %40 = arith.mulf %38, %39 : vector<128x256xf32>
    %c1_32 = arith.constant 1 : index
    %c0_33 = arith.constant 0 : index
    %c0_34 = arith.constant 0 : index
    %41 = vector.load %arg4[%c1_32, %c0_33, %c0_34] : memref<2x128x256xf32, #tpu.memory_space<vmem>>, vector<1x128x256xf32>
    %42 = vector.shape_cast %41 : vector<1x128x256xf32> to vector<128x256xf32>
    %43 = vector.shape_cast %40 : vector<128x256xf32> to vector<1x128x256xf32>
    tpu.vector_store %arg4[%c1_32, %c0_33, %c0_34], %43 {strides = array<i32>} : memref<2x128x256xf32, #tpu.memory_space<vmem>>, vector<1x128x256xf32>,
    return
  }
  func.func @transform_0(%arg0: i32) -> (i32, i32, i32) {
    %c0_i32 = arith.constant 0 : i32
    %c0_i32_0 = arith.constant 0 : i32
    %c0_i32_1 = arith.constant 0 : i32
    return %arg0, %c0_i32, %c0_i32_0 : i32, i32, i32
  }
  func.func @transform_1(%arg0: i32) -> (i32, i32) {
    %c0_i32 = arith.constant 0 : i32
    %c0_i32_0 = arith.constant 0 : i32
    %c0_i32_1 = arith.constant 0 : i32
    return %c0_i32, %c0_i32_0 : i32, i32
  }
  func.func @transform_2(%arg0: i32) -> (i32, i32) {
    %c0_i32 = arith.constant 0 : i32
    %c0_i32_0 = arith.constant 0 : i32
    %c0_i32_1 = arith.constant 0 : i32
    return %c0_i32, %c0_i32_0 : i32, i32
  }
  func.func @transform_3(%arg0: i32) -> (i32, i32, i32) {
    %c0_i32 = arith.constant 0 : i32
    %c0_i32_0 = arith.constant 0 : i32
    %c0_i32_1 = arith.constant 0 : i32
    return %arg0, %c0_i32, %c0_i32_0 : i32, i32, i32
  }
}

</mosaic_0001>

<bundles_post_ra>
// kernel: tpu_custom_call.1
= control target key start
LH: loop header
LB: loop body
LE: loop exit
PB: predicated region body
PF: predicated region fallthrough
CT: control target
= control target key end

     0   :  { %8 = vsyncpa [#allocation4], 0  ;;  %s1573_s0 = inlined_call_operand.hbm [shape: f32[2,128,256], index: 0, kind: input, shape index: {}]   ;;  %s1574_s1 = inlined_call_operand.vmem [shape: f32[8,128], index: 1, kind: input, shape index: {}]   ;;  %s1575_s2 = inlined_call_operand.vmem [shape: f32[128,8], index: 2, kind: input, shape index: {}]   ;;  %s1576_s3 = inlined_call_operand.hbm [shape: f32[2,128,256], index: 3, kind: output, shape index: {}]  }
   0x1   :  { %9 = vsyncpa [#allocation5], 0  ;;  %s1307_s12 = smov [#allocation3]   ;;  %s1259_s16 = scalar_lea.hbm %s1573_s0, 8192 }
   0x2   :  { %s15_s13 = sshll.u32 %s1307_s12, 4  ;;  %p1260_p0 = scmp.ne.s32.totalorder %s1573_s0, %s1259_s16  ;;  %s16_s13 = int_to_ptr.vmem [resolvable:$true] %s15_s13 }
   0x3   :  { %p1263_p1 = scmp.lt.u32.totalorder %s1259_s16, %s1573_s0 }
   0x5   :  { %p1265_p2 = pnand %p1263_p1, %p1260_p0 }
   0x7   :  { %1268 = shalt.err (!%p1265_p2)
}
   0x8   :  { %s1269_s21 = scalar_lea.vmem %s16_s13, 8192  ;;  %p1274_p4 = scmp.lt.s32.totalorder %s16_s13, %s16_s13 }
   0x9   :  { %p1270_p3 = scmp.ne.s32.totalorder %s16_s13, %s1269_s21  ;;  %p1275_p5 = scmp.lt.s32.totalorder %s1269_s21, %s1269_s21 }
   0xb   :  { %p1276_p6 = por %p1275_p5, %p1274_p4 }
   0xd   :  { %p1277_p7 = pnand %p1276_p6, %p1270_p3 }
   0xf   :  { %1280 = shalt.err (!%p1277_p7)
}
  0x10   :  { %s1308_s22 = smov 256   ;;  %s1309_s23 = smov 16  }
  0x11   :  { %21 = dma.hbm_to_vmem [thread:$0]  %s1573_s0, 8192, %s16_s13, [#allocation4], %s1308_s22, %s1308_s22, %s1309_s23  }
  0x12   :  { %1303 = dma.done.wait [#allocation4], 8192  }
  0x13   :  { %1304 = vsyncadd [#allocation4], 4294959104  ;;  %v143_v0 = vld [vmem:[#allocation3 + $0x100] sm:$0xff]  ;;  %v144_v1 = vld [vmem:[#allocation3 + $0x108] sm:$0xff]  ;;  %v1310_v58 = vmov 0.0|0.0   ;;  %vm1311_vm0 = vmmov 0  }
  0x14   :  { %v29_v2 = vld [vmem:[#allocation3] sm:$0xff]  ;;  %v175_v3 = vadd.f32 %v144_v1, %v143_v0  ;;  %v30_v4 = vld [vmem:[#allocation3 + $0x8] sm:$0xff]  ;;  %v1351_v5 = vld [vmem:[#allocation3 + $0x110] sm:$0xff]  ;;  %1115 = vmatprep.subr.bf16.mxu0 %v1310_v58  ;;  %vm125_vm1 = vcmask 7168   ;;  %vm239_vm2 = vcmask 15368   ;;  %vm360_vm3 = vcmask 64512  }
  0x15   :  { %v1353_v6 = vld [vmem:[#allocation3 + $0x118] sm:$0xff]  ;;  %v61_v7 = vadd.f32 %v30_v4, %v29_v2  ;;  %v1355_v8 = vld [vmem:[#allocation3 + $0x10] sm:$0xff]  ;;  %v33_v14 = vld [vmem:[#allocation3 + $0x20] sm:$0xff] }
  0x16   :  { %v1357_v9 = vld [vmem:[#allocation3 + $0x18] sm:$0xff]  ;;  %176 = vadd.xlane.f32.xlu1 %v175_v3  ;;  %v178_v10 = vadd.f32 %v1353_v6, %v1351_v5  ;;  %v1363_v12 = vld [vmem:[#allocation3 + $0x30] sm:$0xff]  ;;  %v34_v15 = vld [vmem:[#allocation3 + $0x28] sm:$0xff] }
  0x17   :  { %62 = vadd.xlane.f32.xlu0 %v61_v7  ;;  %v64_v11 = vadd.f32 %v1357_v9, %v1355_v8  ;;  %v1365_v13 = vld [vmem:[#allocation3 + $0x38] sm:$0xff]  ;;  %v67_v17 = vadd.f32 %v34_v15, %v33_v14  ;;  %v1369_v18 = vld [vmem:[#allocation3 + $0x130] sm:$0xff]  ;;  %v147_v20 = vld [vmem:[#allocation3 + $0x120] sm:$0xff] }
  0x18   :  { %v70_v16 = vadd.f32 %v1365_v13, %v1363_v12  ;;  %v1371_v19 = vld [vmem:[#allocation3 + $0x138] sm:$0xff]  ;;  %v148_v21 = vld [vmem:[#allocation3 + $0x128] sm:$0xff]  ;;  %v39_v24 = vld [vmem:[#allocation3 + $0x50] sm:$0xff] }
  0x19   :  { %v184_v22 = vadd.f32 %v1371_v19, %v1369_v18  ;;  %v181_v23 = vadd.f32 %v148_v21, %v147_v20  ;;  %v40_v25 = vld [vmem:[#allocation3 + $0x58] sm:$0xff]  ;;  %v37_v26 = vld [vmem:[#allocation3 + $0x40] sm:$0xff]  ;;  %v38_v27 = vld [vmem:[#allocation3 + $0x48] sm:$0xff] }
  0x1a   :  { %179 = vadd.xlane.f32.xlu1 %v178_v10  ;;  %v76_v28 = vadd.f32 %v40_v25, %v39_v24  ;;  %v73_v29 = vadd.f32 %v38_v27, %v37_v26  ;;  %v153_v30 = vld [vmem:[#allocation3 + $0x150] sm:$0xff]  ;;  %v154_v31 = vld [vmem:[#allocation3 + $0x158] sm:$0xff]  ;;  %v1375_v32 = vld [vmem:[#allocation3 + $0x140] sm:$0xff] }
  0x1b   :  { %65 = vadd.xlane.f32.xlu0 %v64_v11  ;;  %v1377_v33 = vld [vmem:[#allocation3 + $0x148] sm:$0xff]  ;;  %v190_v34 = vadd.f32 %v154_v31, %v153_v30  ;;  %v43_v36 = vld [vmem:[#allocation3 + $0x70] sm:$0xff]  ;;  %v44_v37 = vld [vmem:[#allocation3 + $0x78] sm:$0xff] }
  0x1c   :  { %v187_v35 = vadd.f32 %v1377_v33, %v1375_v32  ;;  %v41_v38 = vld [vmem:[#allocation3 + $0x60] sm:$0xff]  ;;  %v42_v39 = vld [vmem:[#allocation3 + $0x68] sm:$0xff]  ;;  %v82_v40 = vadd.f32 %v44_v37, %v43_v36  ;;  %v157_v42 = vld [vmem:[#allocation3 + $0x170] sm:$0xff] }
  0x1d   :  { %v79_v41 = vadd.f32 %v42_v39, %v41_v38  ;;  %v158_v43 = vld [vmem:[#allocation3 + $0x178] sm:$0xff]  ;;  %v1381_v44 = vld [vmem:[#allocation3 + $0x160] sm:$0xff]  ;;  %v1383_v45 = vld [vmem:[#allocation3 + $0x168] sm:$0xff] }
  0x1e   :  { %71 = vadd.xlane.f32.xlu1 %v70_v16  ;;  %v196_v46 = vadd.f32 %v158_v43, %v157_v42  ;;  %v193_v47 = vadd.f32 %v1383_v45, %v1381_v44  ;;  %v47_v48 = vld [vmem:[#allocation3 + $0x90] sm:$0xff]  ;;  %v48_v49 = vld [vmem:[#allocation3 + $0x98] sm:$0xff]  ;;  %v45_v50 = vld [vmem:[#allocation3 + $0x80] sm:$0xff]  ;;  %v1312_v43 = vmov 0.0  }
  0x1f   :  { %68 = vadd.xlane.f32.xlu0 %v67_v17  ;;  %v46_v51 = vld [vmem:[#allocation3 + $0x88] sm:$0xff]  ;;  %v88_v52 = vadd.f32 %v48_v49, %v47_v48  ;;  %v161_v54 = vld [vmem:[#allocation3 + $0x190] sm:$0xff]  ;;  %v162_v55 = vld [vmem:[#allocation3 + $0x198] sm:$0xff]  ;;  %1086 = vmatprep.mubr.msk.f32.mxu0 %vm1311_vm0, %v1312_v43 }
  0x20   :  { %v85_v53 = vadd.f32 %v46_v51, %v45_v50  ;;  %v1387_v56 = vld [vmem:[#allocation3 + $0x180] sm:$0xff]  ;;  %v1389_v57 = vld [vmem:[#allocation3 + $0x188] sm:$0xff]  ;;  %v202_v59 = vadd.f32 %v162_v55, %v161_v54  ;;  %v51_v61 = vld [vmem:[#allocation3 + $0xb0] sm:$0xff] }
  0x21   :  { %v199_v60 = vadd.f32 %v1389_v57, %v1387_v56  ;;  %v52_v62 = vld [vmem:[#allocation3 + $0xb8] sm:$0xff]  ;;  %v49_v63 = vld [vmem:[#allocation3 + $0xa0] sm:$0xff]  ;;  %v50_v0 = vld [vmem:[#allocation3 + $0xa8] sm:$0xff] }
  0x22   :  { %185 = vadd.xlane.f32.xlu1 %v184_v22  ;;  %v94_v1 = vadd.f32 %v52_v62, %v51_v61  ;;  %v91_v2 = vadd.f32 %v50_v0, %v49_v63  ;;  %v165_v3 = vld [vmem:[#allocation3 + $0x1b0] sm:$0xff]  ;;  %v166_v4 = vld [vmem:[#allocation3 + $0x1b8] sm:$0xff]  ;;  %v163_v7 = vld [vmem:[#allocation3 + $0x1a0] sm:$0xff] }
  0x23   :  { %182 = vadd.xlane.f32.xlu0 %v181_v23  ;;  %v164_v10 = vld [vmem:[#allocation3 + $0x1a8] sm:$0xff]  ;;  %v208_v11 = vadd.f32 %v166_v4, %v165_v3  ;;  %v55_v15 = vld [vmem:[#allocation3 + $0xd0] sm:$0xff]  ;;  %v56_v16 = vld [vmem:[#allocation3 + $0xd8] sm:$0xff] }
  0x24   :  { %v205_v14 = vadd.f32 %v164_v10, %v163_v7  ;;  %v53_v17 = vld [vmem:[#allocation3 + $0xc0] sm:$0xff]  ;;  %v54_v20 = vld [vmem:[#allocation3 + $0xc8] sm:$0xff]  ;;  %v100_v21 = vadd.f32 %v56_v16, %v55_v15  ;;  %v169_v23 = vld [vmem:[#allocation3 + $0x1d0] sm:$0xff] }
  0x25   :  { %v97_v22 = vadd.f32 %v54_v20, %v53_v17  ;;  %v170_v24 = vld [vmem:[#allocation3 + $0x1d8] sm:$0xff]  ;;  %v167_v25 = vld [vmem:[#allocation3 + $0x1c0] sm:$0xff]  ;;  %v168_v26 = vld [vmem:[#allocation3 + $0x1c8] sm:$0xff] }
  0x26   :  { %77 = vadd.xlane.f32.xlu1 %v76_v28  ;;  %v214_v27 = vadd.f32 %v170_v24, %v169_v23  ;;  %v211_v28 = vadd.f32 %v168_v26, %v167_v25  ;;  %v60_v30 = vld [vmem:[#allocation3 + $0xf8] sm:$0xff]  ;;  %v57_v31 = vld [vmem:[#allocation3 + $0xe0] sm:$0xff]  ;;  %v173_v37 = vld [vmem:[#allocation3 + $0x1f0] sm:$0xff] }
  0x27   :  { %74 = vadd.xlane.f32.xlu0 %v73_v29  ;;  %v59_v29 = vld [vmem:[#allocation3 + $0xf0] sm:$0xff]  ;;  %v174_v38 = vld [vmem:[#allocation3 + $0x1f8] sm:$0xff]  ;;  %v171_v39 = vld [vmem:[#allocation3 + $0x1e0] sm:$0xff] }
  0x2a   :  { %191 = vadd.xlane.f32.xlu1 %v190_v34  ;;  %v58_v34 = vld [vmem:[#allocation3 + $0xe8] sm:$0xff] }
  0x2b   :  { %188 = vadd.xlane.f32.xlu0 %v187_v35  ;;  %v106_v35 = vadd.f32 %v60_v30, %v59_v29  ;;  %v103_v36 = vadd.f32 %v58_v34, %v57_v31 }
  0x2e   :  { %83 = vadd.xlane.f32.xlu1 %v82_v40  ;;  %v172_v40 = vld [vmem:[#allocation3 + $0x1e8] sm:$0xff] }
  0x2f   :  { %80 = vadd.xlane.f32.xlu0 %v79_v41  ;;  %v220_v41 = vadd.f32 %v174_v38, %v173_v37  ;;  %v217_v42 = vadd.f32 %v172_v40, %v171_v39 }
  0x32   :  { %197 = vadd.xlane.f32.xlu1 %v196_v46 }
  0x33   :  { %194 = vadd.xlane.f32.xlu0 %v193_v47 }
  0x36   :  { %89 = vadd.xlane.f32.xlu1 %v88_v52 }
  0x37   :  { %86 = vadd.xlane.f32.xlu0 %v85_v53 }
  0x3a   :  { %203 = vadd.xlane.f32.xlu1 %v202_v59 }
  0x3b   :  { %200 = vadd.xlane.f32.xlu0 %v199_v60 }
  0x3e   :  { %95 = vadd.xlane.f32.xlu1 %v94_v1 }
  0x3f   :  { %92 = vadd.xlane.f32.xlu0 %v91_v2 }
  0x42   :  { %209 = vadd.xlane.f32.xlu1 %v208_v11 }
  0x43   :  { %206 = vadd.xlane.f32.xlu0 %v205_v14 }
  0x46   :  { %101 = vadd.xlane.f32.xlu1 %v100_v21 }
  0x47   :  { %98 = vadd.xlane.f32.xlu0 %v97_v22 }
  0x4a   :  { %215 = vadd.xlane.f32.xlu1 %v214_v27 }
  0x4b   :  { %212 = vadd.xlane.f32.xlu0 %v211_v28 }
  0x4e   :  { %107 = vadd.xlane.f32.xlu1 %v106_v35 }
  0x4f   :  { %104 = vadd.xlane.f32.xlu0 %v103_v36 }
  0x52   :  { %221 = vadd.xlane.f32.xlu1 %v220_v41 }
  0x53   :  { %218 = vadd.xlane.f32.xlu0 %v217_v42 }
  0xa3   :  { %v177_v46 = vpop.xlane.xlu1 %176 }
  0xa4   :  { %v223_v47 = vmul.f32 0.00390625, %v177_v46  ;;  %v63_v48 = vpop.xlane.xlu0 %62 }
  0xa5   :  { %v109_v49 = vmul.f32 0.00390625, %v63_v48 }
  0xa7   :  { %126 = vst.msk [vmem:[#allocation2] sm:$0xff] %vm125_vm1, %v109_v49  ;;  %v180_v50 = vpop.xlane.xlu1 %179 }
  0xa8   :  { %240 = vst.msk [vmem:[#allocation2] sm:$0xff] %vm239_vm2, %v223_v47  ;;  %v224_v51 = vmul.f32 0.00390625, %v180_v50  ;;  %v66_v52 = vpop.xlane.xlu0 %65 }
  0xa9   :  { %v110_v53 = vmul.f32 0.00390625, %v66_v52 }
  0xab   :  { %127 = vst.msk [vmem:[#allocation2 + $0x8] sm:$0xff] %vm125_vm1, %v110_v53  ;;  %v72_v54 = vpop.xlane.xlu1 %71 }
  0xac   :  { %241 = vst.msk [vmem:[#allocation2 + $0x8] sm:$0xff] %vm239_vm2, %v224_v51  ;;  %v112_v55 = vmul.f32 0.00390625, %v72_v54  ;;  %v69_v59 = vpop.xlane.xlu0 %68 }
  0xad   :  { %v111_v60 = vmul.f32 0.00390625, %v69_v59 }
  0xae   :  { %129 = vst.msk [vmem:[#allocation2 + $0x18] sm:$0xff] %vm125_vm1, %v112_v55 }
  0xaf   :  { %128 = vst.msk [vmem:[#allocation2 + $0x10] sm:$0xff] %vm125_vm1, %v111_v60  ;;  %v186_v61 = vpop.xlane.xlu1 %185  ;;  %v257_v2 = vld [vmem:[#allocation2] sm:$0xff] }
  0xb0   :  { %v226_v62 = vmul.f32 0.00390625, %v186_v61  ;;  %v183_v63 = vpop.xlane.xlu0 %182 }
  0xb1   :  { %v225_v0 = vmul.f32 0.00390625, %v183_v63 }
  0xb2   :  { %243 = vst.msk [vmem:[#allocation2 + $0x18] sm:$0xff] %vm239_vm2, %v226_v62 }
  0xb3   :  { %242 = vst.msk [vmem:[#allocation2 + $0x10] sm:$0xff] %vm239_vm2, %v225_v0  ;;  %v78_v1 = vpop.xlane.xlu1 %77  ;;  %v258_v3 = vld [vmem:[#allocation2 + $0x8] sm:$0xff] }
  0xb4   :  { %v114_v4 = vmul.f32 0.00390625, %v78_v1  ;;  %v75_v7 = vpop.xlane.xlu0 %74  ;;  %v1116_v10 = vpack.c.bf16 %v258_v3, %v257_v2 }
  0xb5   :  { %v113_v11 = vmul.f32 0.00390625, %v75_v7 }
  0xb6   :  { %131 = vst.msk [vmem:[#allocation2 + $0x28] sm:$0xff] %vm125_vm1, %v114_v4  ;;  %1117 = vmatpush3.bf16.msra.mxu0 %v1116_v10 }
  0xb7   :  { %130 = vst.msk [vmem:[#allocation2 + $0x20] sm:$0xff] %vm125_vm1, %v113_v11  ;;  %v192_v14 = vpop.xlane.xlu1 %191  ;;  %1118 = vmatprep.subr.bf16.mxu0 %v1310_v58 }
  0xb8   :  { %v228_v15 = vmul.f32 0.00390625, %v192_v14  ;;  %v189_v16 = vpop.xlane.xlu0 %188 }
  0xb9   :  { %v227_v17 = vmul.f32 0.00390625, %v189_v16  ;;  %v260_v20 = vld [vmem:[#allocation2 + $0x18] sm:$0xff] }
  0xba   :  { %245 = vst.msk [vmem:[#allocation2 + $0x28] sm:$0xff] %vm239_vm2, %v228_v15  ;;  %v259_v21 = vld [vmem:[#allocation2 + $0x10] sm:$0xff] }
  0xbb   :  { %244 = vst.msk [vmem:[#allocation2 + $0x20] sm:$0xff] %vm239_vm2, %v227_v17  ;;  %v84_v22 = vpop.xlane.xlu1 %83  ;;  %v1119_v23 = vpack.c.bf16 %v260_v20, %v259_v21 }
  0xbc   :  { %v116_v24 = vmul.f32 0.00390625, %v84_v22  ;;  %v81_v25 = vpop.xlane.xlu0 %80 }
  0xbd   :  { %v115_v26 = vmul.f32 0.00390625, %v81_v25  ;;  %1120 = vmatpush3.bf16.msra.mxu0 %v1119_v23 }
  0xbe   :  { %133 = vst.msk [vmem:[#allocation2 + $0x38] sm:$0xff] %vm125_vm1, %v116_v24  ;;  %1121 = vmatprep.subr.bf16.mxu0 %v1310_v58 }
  0xbf   :  { %132 = vst.msk [vmem:[#allocation2 + $0x30] sm:$0xff] %vm125_vm1, %v115_v26  ;;  %v198_v27 = vpop.xlane.xlu1 %197 }
  0xc0   :  { %v230_v28 = vmul.f32 0.00390625, %v198_v27  ;;  %v195_v29 = vpop.xlane.xlu0 %194 }
  0xc1   :  { %v229_v30 = vmul.f32 0.00390625, %v195_v29  ;;  %v262_v31 = vld [vmem:[#allocation2 + $0x28] sm:$0xff] }
  0xc2   :  { %247 = vst.msk [vmem:[#allocation2 + $0x38] sm:$0xff] %vm239_vm2, %v230_v28  ;;  %v261_v34 = vld [vmem:[#allocation2 + $0x20] sm:$0xff] }
  0xc3   :  { %246 = vst.msk [vmem:[#allocation2 + $0x30] sm:$0xff] %vm239_vm2, %v229_v30  ;;  %v90_v35 = vpop.xlane.xlu1 %89  ;;  %v1122_v36 = vpack.c.bf16 %v262_v31, %v261_v34  ;;  %v256_v34 = vld [vmem:[%s1574_s1] sm:$0xff] }
  0xc4   :  { %v118_v37 = vmul.f32 0.00390625, %v90_v35  ;;  %v87_v38 = vpop.xlane.xlu0 %86  ;;  %v344_v35 = vld [vmem:[%s1575_s2] sm:$0xff] }
  0xc5   :  { %v117_v39 = vmul.f32 0.00390625, %v87_v38  ;;  %1123 = vmatpush3.bf16.msra.mxu0 %v1122_v36  ;;  %1091 = vmatprep.mubr.msk.f32.mxu1 %vm360_vm3, %v344_v35 }
  0xc6   :  { %135 = vst.msk [vmem:[#allocation2 + $0x48] sm:$0xff] %vm125_vm1, %v118_v37  ;;  %1124 = vmatprep.subr.bf16.mxu0 %v1310_v58 }
  0xc7   :  { %134 = vst.msk [vmem:[#allocation2 + $0x40] sm:$0xff] %vm125_vm1, %v117_v39  ;;  %v204_v40 = vpop.xlane.xlu1 %203  ;;  %v346_v39 = vld [vmem:[%s1575_s2 + $0x10] sm:$0xff] }
  0xc8   :  { %v232_v41 = vmul.f32 0.00390625, %v204_v40  ;;  %v201_v42 = vpop.xlane.xlu0 %200  ;;  %v347_v40 = vld [vmem:[%s1575_s2 + $0x18] sm:$0xff] }
  0xc9   :  { %v231_v43 = vmul.f32 0.00390625, %v201_v42  ;;  %v264_v46 = vld [vmem:[#allocation2 + $0x38] sm:$0xff]  ;;  %v349_v42 = vld [vmem:[%s1575_s2 + $0x28] sm:$0xff] }
  0xca   :  { %249 = vst.msk [vmem:[#allocation2 + $0x48] sm:$0xff] %vm239_vm2, %v232_v41  ;;  %v263_v47 = vld [vmem:[#allocation2 + $0x30] sm:$0xff]  ;;  %v348_v41 = vld [vmem:[%s1575_s2 + $0x20] sm:$0xff] }
  0xcb   :  { %248 = vst.msk [vmem:[#allocation2 + $0x40] sm:$0xff] %vm239_vm2, %v231_v43  ;;  %v96_v48 = vpop.xlane.xlu1 %95  ;;  %v1125_v49 = vpack.c.bf16 %v264_v46, %v263_v47  ;;  %v350_v43 = vld [vmem:[%s1575_s2 + $0x30] sm:$0xff]  ;;  %v351_v46 = vld [vmem:[%s1575_s2 + $0x38] sm:$0xff]  ;;  %v352_v47 = vld [vmem:[%s1575_s2 + $0x40] sm:$0xff] }
  0xcc   :  { %v120_v50 = vmul.f32 0.00390625, %v96_v48  ;;  %v93_v51 = vpop.xlane.xlu0 %92  ;;  %v353_v48 = vld [vmem:[%s1575_s2 + $0x48] sm:$0xff] }
  0xcd   :  { %v119_v52 = vmul.f32 0.00390625, %v93_v51  ;;  %1126 = vmatpush3.bf16.msra.mxu0 %v1125_v49  ;;  %v354_v49 = vld [vmem:[%s1575_s2 + $0x50] sm:$0xff]  ;;  %v356_v51 = vld [vmem:[%s1575_s2 + $0x60] sm:$0xff] }
  0xce   :  { %137 = vst.msk [vmem:[#allocation2 + $0x58] sm:$0xff] %vm125_vm1, %v120_v50  ;;  %1127 = vmatprep.subr.bf16.mxu0 %v1310_v58  ;;  %v355_v50 = vld [vmem:[%s1575_s2 + $0x58] sm:$0xff] }
  0xcf   :  { %136 = vst.msk [vmem:[#allocation2 + $0x50] sm:$0xff] %vm125_vm1, %v119_v52  ;;  %v210_v53 = vpop.xlane.xlu1 %209  ;;  %v357_v52 = vld [vmem:[%s1575_s2 + $0x68] sm:$0xff] }
  0xd0   :  { %v234_v54 = vmul.f32 0.00390625, %v210_v53  ;;  %v207_v55 = vpop.xlane.xlu0 %206  ;;  %v358_v53 = vld [vmem:[%s1575_s2 + $0x70] sm:$0xff] }
  0xd1   :  { %v233_v59 = vmul.f32 0.00390625, %v207_v55  ;;  %v266_v60 = vld [vmem:[#allocation2 + $0x48] sm:$0xff]  ;;  %v1313_v55 = vmov 1  }
  0xd2   :  { %251 = vst.msk [vmem:[#allocation2 + $0x58] sm:$0xff] %vm239_vm2, %v234_v54  ;;  %v265_v61 = vld [vmem:[#allocation2 + $0x40] sm:$0xff]  ;;  %v359_v54 = vld [vmem:[%s1575_s2 + $0x78] sm:$0xff]  ;;  %1149 = vset.pattern.permute.xlu0 %v1313_v55 }
  0xd3   :  { %250 = vst.msk [vmem:[#allocation2 + $0x50] sm:$0xff] %vm239_vm2, %v233_v59  ;;  %v102_v62 = vpop.xlane.xlu1 %101  ;;  %v1128_v63 = vpack.c.bf16 %v266_v60, %v265_v61  ;;  %v1314_v59 = vmov 0  }
  0xd4   :  { %v122_v0 = vmul.f32 0.00390625, %v102_v62  ;;  %v99_v1 = vpop.xlane.xlu0 %98  ;;  %1148 = vset.pattern.permute.xlu1 %v1314_v59 }
  0xd5   :  { %v121_v2 = vmul.f32 0.00390625, %v99_v1  ;;  %1129 = vmatpush3.bf16.msra.mxu0 %v1128_v63 }
  0xd6   :  { %139 = vst.msk [vmem:[#allocation2 + $0x68] sm:$0xff] %vm125_vm1, %v122_v0  ;;  %1130 = vmatprep.subr.bf16.mxu0 %v1310_v58 }
  0xd7   :  { %138 = vst.msk [vmem:[#allocation2 + $0x60] sm:$0xff] %vm125_vm1, %v121_v2  ;;  %v216_v3 = vpop.xlane.xlu1 %215 }
  0xd8   :  { %v236_v4 = vmul.f32 0.00390625, %v216_v3  ;;  %v213_v7 = vpop.xlane.xlu0 %212 }
  0xd9   :  { %v235_v10 = vmul.f32 0.00390625, %v213_v7  ;;  %v268_v11 = vld [vmem:[#allocation2 + $0x58] sm:$0xff] }
  0xda   :  { %253 = vst.msk [vmem:[#allocation2 + $0x68] sm:$0xff] %vm239_vm2, %v236_v4  ;;  %v267_v14 = vld [vmem:[#allocation2 + $0x50] sm:$0xff] }
  0xdb   :  { %252 = vst.msk [vmem:[#allocation2 + $0x60] sm:$0xff] %vm239_vm2, %v235_v10  ;;  %v108_v15 = vpop.xlane.xlu1 %107  ;;  %v1131_v16 = vpack.c.bf16 %v268_v11, %v267_v14 }
  0xdc   :  { %v124_v17 = vmul.f32 0.00390625, %v108_v15  ;;  %v105_v20 = vpop.xlane.xlu0 %104 }
  0xdd   :  { %v123_v21 = vmul.f32 0.00390625, %v105_v20  ;;  %1132 = vmatpush3.bf16.msra.mxu0 %v1131_v16 }
  0xde   :  { %141 = vst.msk [vmem:[#allocation2 + $0x78] sm:$0xff] %vm125_vm1, %v124_v17  ;;  %1133 = vmatprep.subr.bf16.mxu0 %v1310_v58 }
  0xdf   :  { %140 = vst.msk [vmem:[#allocation2 + $0x70] sm:$0xff] %vm125_vm1, %v123_v21  ;;  %v222_v22 = vpop.xlane.xlu1 %221 }
  0xe0   :  { %v238_v23 = vmul.f32 0.00390625, %v222_v22  ;;  %v219_v24 = vpop.xlane.xlu0 %218 }
  0xe1   :  { %v237_v25 = vmul.f32 0.00390625, %v219_v24  ;;  %v270_v26 = vld [vmem:[#allocation2 + $0x68] sm:$0xff] }
  0xe2   :  { %255 = vst.msk [vmem:[#allocation2 + $0x78] sm:$0xff] %vm239_vm2, %v238_v23  ;;  %v269_v27 = vld [vmem:[#allocation2 + $0x60] sm:$0xff] }
  0xe3   :  { %254 = vst.msk [vmem:[#allocation2 + $0x70] sm:$0xff] %vm239_vm2, %v237_v25  ;;  %v1134_v28 = vpack.c.bf16 %v270_v26, %v269_v27 }
  0xe5   :  { %1135 = vmatpush3.bf16.msra.mxu0 %v1134_v28 }
  0xe6   :  { %1136 = vmatprep.subr.bf16.mxu0 %v1310_v58  ;;  %v345_v58 = vld [vmem:[%s1575_s2 + $0x8] sm:$0xff]  ;;  %s1315_s2 = smov [#allocation6]  }
  0xe7   :  { %s992_s5 = sshll.u32 %s1315_s2, 4  ;;  %s993_s5 = int_to_ptr.vmem [resolvable:$true] %s992_s5 }
  0xe8   :  { %s1281_s1 = scalar_lea.vmem %s993_s5, 8192  ;;  %p1286_p9 = scmp.lt.s32.totalorder %s993_s5, %s993_s5 }
  0xe9   :  { %v272_v29 = vld [vmem:[#allocation2 + $0x78] sm:$0xff]  ;;  %p1282_p8 = scmp.ne.s32.totalorder %s993_s5, %s1281_s1  ;;  %p1287_p10 = scmp.lt.s32.totalorder %s1281_s1, %s1281_s1 }
  0xea   :  { %v271_v30 = vld [vmem:[#allocation2 + $0x70] sm:$0xff] }
  0xeb   :  { %v1137_v31 = vpack.c.bf16 %v272_v29, %v271_v30  ;;  %p1288_p11 = por %p1287_p10, %p1286_p9 }
  0xed   :  { %1138 = vmatpush3.bf16.msra.mxu0 %v1137_v31  ;;  %p1289_p12 = pnand %p1288_p11, %p1282_p8 }
  0xf0   :  { %1087 = vmatmul.mubr.f32.vlgmr.msra.gmra.mrb[0].mxu0 %v256_v34 }
 0x1c3   :  { %v339_v36 = vpop.f32.mrb[0].mxu0 }
 0x1c4   :  { %v343_v37 = vmax.f32 %v339_v36, 0.0  ;;  %v1088_v38 = vpop.f32.mrb[1].mxu0 }
 0x1c6   :  { %1089 = vmatprep.subr.mxu1 %v343_v37 }
 0x1c7   :  { %1090 = vmatpush3.msra.mxu1 %v343_v37 }
 0x1c8   :  { %1092 = vmatmul.mubr.msk.f32.vlgmr.msra.gmra.mrb[0].mxu1 %vm360_vm3, %v345_v58 }
 0x1c9   :  { %1094 = vmatprep.mubr.msk.f32.mxu1 %vm360_vm3, %v346_v39 }
 0x1cc   :  { %1095 = vmatmul.mubr.msk.f32.gmra.mrb[2].mxu1 %vm360_vm3, %v347_v40 }
 0x1cd   :  { %1097 = vmatprep.mubr.msk.f32.mxu1 %vm360_vm3, %v348_v41 }
 0x1d0   :  { %1098 = vmatmul.mubr.msk.f32.gmra.mrb[4].mxu1 %vm360_vm3, %v349_v42 }
 0x1d1   :  { %1100 = vmatprep.mubr.msk.f32.mxu1 %vm360_vm3, %v350_v43 }
 0x1d4   :  { %1101 = vmatmul.mubr.msk.f32.gmra.mrb[6].mxu1 %vm360_vm3, %v351_v46 }
 0x1d5   :  { %1103 = vmatprep.mubr.msk.f32.mxu1 %vm360_vm3, %v352_v47 }
 0x1d8   :  { %1104 = vmatmul.mubr.msk.f32.gmra.mrb[8].mxu1 %vm360_vm3, %v353_v48 }
 0x1d9   :  { %1106 = vmatprep.mubr.msk.f32.mxu1 %vm360_vm3, %v354_v49 }
 0x1dc   :  { %1107 = vmatmul.mubr.msk.f32.gmra.mrb[10].mxu1 %vm360_vm3, %v355_v50 }
 0x1dd   :  { %1109 = vmatprep.mubr.msk.f32.mxu1 %vm360_vm3, %v356_v51 }
 0x1e0   :  { %1110 = vmatmul.mubr.msk.f32.gmra.mrb[12].mxu1 %vm360_vm3, %v357_v52 }
 0x1e1   :  { %1112 = vmatprep.mubr.msk.f32.mxu1 %vm360_vm3, %v358_v53 }
 0x1e4   :  { %1113 = vmatmul.mubr.msk.f32.gmra.mrb[14].mxu1 %vm360_vm3, %v359_v54 }
 0x29b   :  { %v1093_v60 = vpop.f32.mrb[0].mxu1 }
 0x29c   :  { %v555_v61 = vsub.f32 0.0, %v1093_v60  ;;  %v475_v62 = vpop.f32.mrb[1].mxu1 }
 0x29d   :  { %v554_v63 = vsub.f32 0.0, %v475_v62 }
 0x29e   :  { %v572_v0 = vmul.f32 1.442695, %v555_v61 }
 0x29f   :  { %v570_v1 = vmul.f32 1.442695, %v554_v63  ;;  %v1096_v2 = vpop.f32.mrb[2].mxu1 }
 0x2a0   :  { %1177 = vpow2.f32 %v572_v0  ;;  %v557_v3 = vsub.f32 0.0, %v1096_v2  ;;  %v485_v4 = vpop.f32.mrb[3].mxu1 }
 0x2a1   :  { %1179 = vpow2.f32 %v570_v1  ;;  %v556_v15 = vsub.f32 0.0, %v485_v4 }
 0x2a2   :  { %v576_v7 = vmul.f32 1.442695, %v557_v3 }
 0x2a3   :  { %v1099_v10 = vpop.f32.mrb[4].mxu1  ;;  %v574_v23 = vmul.f32 1.442695, %v556_v15 }
 0x2a4   :  { %1181 = vpow2.f32 %v576_v7  ;;  %v495_v11 = vpop.f32.mrb[5].mxu1  ;;  %v559_v36 = vsub.f32 0.0, %v1099_v10 }
 0x2a5   :  { %v558_v14 = vsub.f32 0.0, %v495_v11 }
 0x2a6   :  { %v580_v42 = vmul.f32 1.442695, %v559_v36 }
 0x2a7   :  { %v578_v16 = vmul.f32 1.442695, %v558_v14  ;;  %v1502_v17 = vpop.f32.mrb[6].mxu1 }
 0x2a8   :  { %v505_v20 = vpop.f32.mrb[7].mxu1  ;;  %v561_v4 = vsub.f32 0.0, %v1502_v17 }
 0x2a9   :  { %1183 = vpow2.f32 %v578_v16  ;;  %v560_v21 = vsub.f32 0.0, %v505_v20 }
 0x2aa   :  { %v1178_v22 = vpop.eup %1177 }
 0x2ab   :  { %v1180_v24 = vpop.eup %1179  ;;  %v603_v25 = vadd.f32 1.0, %v1178_v22  ;;  %v582_v26 = vmul.f32 1.442695, %v560_v21  ;;  %v1105_v27 = vpop.f32.mrb[8].mxu1  ;;  %v584_v21 = vmul.f32 1.442695, %v561_v4 }
 0x2ac   :  { %v563_v28 = vsub.f32 0.0, %v1105_v27  ;;  %v515_v29 = vpop.f32.mrb[9].mxu1  ;;  %v602_v34 = vadd.f32 1.0, %v1180_v24 }
 0x2ad   :  { %1185 = vrcp.f32 %v603_v25  ;;  %v562_v30 = vsub.f32 0.0, %v515_v29 }
 0x2ae   :  { %v1182_v31 = vpop.eup %1181  ;;  %1187 = vpow2.f32 %v574_v23  ;;  %v588_v35 = vmul.f32 1.442695, %v563_v28 }
 0x2af   :  { %1189 = vpow2.f32 %v582_v26  ;;  %v586_v37 = vmul.f32 1.442695, %v562_v30  ;;  %v1108_v38 = vpop.f32.mrb[10].mxu1  ;;  %v605_v40 = vadd.f32 1.0, %v1182_v31 }
 0x2b0   :  { %1191 = vpow2.f32 %v588_v35  ;;  %v565_v58 = vsub.f32 0.0, %v1108_v38  ;;  %v525_v39 = vpop.f32.mrb[11].mxu1 }
 0x2b1   :  { %1193 = vrcp.f32 %v602_v34  ;;  %v564_v49 = vsub.f32 0.0, %v525_v39 }
 0x2b2   :  { %1195 = vpow2.f32 %v586_v37  ;;  %v592_v47 = vmul.f32 1.442695, %v565_v58 }
 0x2b3   :  { %v1184_v41 = vpop.eup %1183  ;;  %v1111_v43 = vpop.f32.mrb[12].mxu1  ;;  %1197 = vrcp.f32 %v605_v40  ;;  %v590_v60 = vmul.f32 1.442695, %v564_v49 }
 0x2b4   :  { %v606_v46 = vadd.f32 1.0, %v1184_v41  ;;  %v535_v48 = vpop.f32.mrb[13].mxu1  ;;  %v567_v63 = vsub.f32 0.0, %v1111_v43 }
 0x2b5   :  { %v566_v11 = vsub.f32 0.0, %v535_v48 }
 0x2b6   :  { %1199 = vrcp.f32 %v606_v46  ;;  %v596_v7 = vmul.f32 1.442695, %v567_v63 }
 0x2b7   :  { %v1186_v50 = vpop.eup %1185  ;;  %1201 = vpow2.f32 %v580_v42  ;;  %v1114_v51 = vpop.f32.mrb[14].mxu1  ;;  %v594_v17 = vmul.f32 1.442695, %v566_v11 }
 0x2b8   :  { %v1188_v52 = vpop.eup %1187  ;;  %863 = vperm.xlu0 %1149, %v1186_v50   ;;  %689 = vperm.xlu1 %1148, %v1186_v50   ;;  %1203 = vpow2.f32 %v592_v47  ;;  %v545_v53 = vpop.f32.mrb[15].mxu1  ;;  %v569_v23 = vsub.f32 0.0, %v1114_v51 }
 0x2b9   :  { %v1190_v54 = vpop.eup %1189  ;;  %v604_v3 = vadd.f32 1.0, %v1188_v52  ;;  %v568_v29 = vsub.f32 0.0, %v545_v53 }
 0x2ba   :  { %v1192_v61 = vpop.eup %1191  ;;  %v608_v62 = vadd.f32 1.0, %v1190_v54  ;;  %v600_v27 = vmul.f32 1.442695, %v569_v23 }
 0x2bb   :  { %v611_v0 = vadd.f32 1.0, %v1192_v61  ;;  %v1194_v1 = vpop.eup %1193  ;;  %v598_v35 = vmul.f32 1.442695, %v568_v29 }
 0x2bc   :  { %1150 = vset.pattern.permute.xlu0 %v1314_v59  ;;  %1151 = vset.pattern.permute.xlu1 %v1313_v55  ;;  %1205 = vrcp.f32 %v608_v62  ;;  %v1196_v2 = vpop.eup %1195 }
 0x2bd   :  { %859 = vperm.xlu1 %1151, %v1194_v1   ;;  %684 = vperm.xlu0 %1150, %v1194_v1   ;;  %1207 = vpow2.f32 %v590_v60  ;;  %v1198_v10 = vpop.eup %1197  ;;  %v610_v15 = vadd.f32 1.0, %v1196_v2 }
 0x2be   :  { %1209 = vrcp.f32 %v611_v0 }
 0x2bf   :  { %1211 = vrcp.f32 %v604_v3  ;;  %v1241_v3 = vld [vmem:[#allocation3 + $0x100] sm:$0xff] }
 0x2c0   :  { %v1507_v14 = vpop.eup %1199  ;;  %1213 = vpow2.f32 %v596_v7 }
 0x2c1   :  { %v1202_v16 = vpop.eup %1201  ;;  %1152 = vset.pattern.permute.xlu1 %v1314_v59  ;;  %1159 = vset.pattern.permute.xlu0 %v1313_v55  ;;  %1215 = vrcp.f32 %v610_v15 }
 0x2c2   :  { %v1204_v20 = vpop.eup %1203  ;;  %699 = vperm.xlu1 %1152, %v1198_v10   ;;  %875 = vperm.xlu0 %1159, %v1507_v14   ;;  %v607_v22 = vadd.f32 1.0, %v1202_v16  ;;  %1217 = vpow2.f32 %v584_v21 }
 0x2c3   :  { %v613_v24 = vadd.f32 1.0, %v1204_v20  ;;  %1219 = vpow2.f32 %v594_v17 }
 0x2c4   :  { %1221 = vrcp.f32 %v607_v22 }
 0x2c5   :  { %1223 = vrcp.f32 %v613_v24 }
 0x2c6   :  { %v1512_v25 = vpop.eup %1205  ;;  %1153 = vset.pattern.permute.xlu1 %v1313_v55  ;;  %1225 = vpow2.f32 %v600_v27 }
 0x2c7   :  { %v1208_v26 = vpop.eup %1207  ;;  %871 = vperm.xlu1 %1153, %v1198_v10   ;;  %883 = vperm.xlu0 %1159, %v1512_v25   ;;  %v1243_v10 = vld [vmem:[#allocation3] sm:$0xff] }
 0x2c8   :  { %v1516_v28 = vpop.eup %1209  ;;  %v612_v30 = vadd.f32 1.0, %v1208_v26  ;;  %v1245_v26 = vld [vmem:[#allocation3 + $0x20] sm:$0xff] }
 0x2c9   :  { %v1212_v31 = vpop.eup %1211 }
 0x2ca   :  { %v1214_v34 = vpop.eup %1213  ;;  %1227 = vrcp.f32 %v612_v30 }
 0x2cb   :  { %1154 = vset.pattern.permute.xlu1 %v1314_v59  ;;  %1162 = vset.pattern.permute.xlu0 %v1314_v59  ;;  %v1216_v36 = vpop.eup %1215  ;;  %v615_v37 = vadd.f32 1.0, %v1214_v34  ;;  %1229 = vpow2.f32 %v598_v35  ;;  %v1248_v34 = vld [vmem:[#allocation3 + $0x128] sm:$0xff] }
 0x2cc   :  { %694 = vperm.xlu1 %1154, %v1212_v31   ;;  %729 = vperm.xlu0 %1162, %v1516_v28   ;;  %v1218_v38 = vpop.eup %1217 }
 0x2cd   :  { %v1220_v58 = vpop.eup %1219  ;;  %v609_v41 = vadd.f32 1.0, %v1218_v38  ;;  %1231 = vrcp.f32 %v615_v37  ;;  %v672_v38 = vld [vmem:[#allocation3 + $0xb0] sm:$0xff] }
 0x2ce   :  { %v1222_v39 = vpop.eup %1221  ;;  %v614_v42 = vadd.f32 1.0, %v1220_v58  ;;  %v673_v58 = vld [vmem:[#allocation3 + $0xb8] sm:$0xff] }
 0x2cf   :  { %v1224_v40 = vpop.eup %1223  ;;  %1233 = vrcp.f32 %v609_v41  ;;  %v1249_v41 = vld [vmem:[#allocation3 + $0x50] sm:$0xff] }
 0x2d0   :  { %1155 = vset.pattern.permute.xlu1 %v1313_v55  ;;  %1165 = vset.pattern.permute.xlu0 %v1313_v55  ;;  %v1226_v43 = vpop.eup %1225  ;;  %1235 = vrcp.f32 %v614_v42 }
 0x2d1   :  { %867 = vperm.xlu1 %1155, %v1212_v31   ;;  %891 = vperm.xlu0 %1165, %v1216_v36   ;;  %v617_v47 = vadd.f32 1.0, %v1226_v43  ;;  %v1250_v43 = vld [vmem:[#allocation3 + $0x58] sm:$0xff] }
 0x2d3   :  { %1237 = vrcp.f32 %v617_v47 }
 0x2d4   :  { %v1228_v46 = vpop.eup %1227 }
 0x2d5   :  { %1156 = vset.pattern.permute.xlu1 %v1314_v59  ;;  %1166 = vset.pattern.permute.xlu0 %v1314_v59  ;;  %v1230_v48 = vpop.eup %1229 }
 0x2d6   :  { %709 = vperm.xlu1 %1156, %v1222_v39   ;;  %739 = vperm.xlu0 %1166, %v1224_v40   ;;  %v616_v50 = vadd.f32 1.0, %v1230_v48 }
 0x2d7   :  { %v1232_v49 = vpop.eup %1231 }
 0x2d8   :  { %1239 = vrcp.f32 %v616_v50 }
 0x2d9   :  { %v1234_v51 = vpop.eup %1233 }
 0x2da   :  { %1157 = vset.pattern.permute.xlu1 %v1313_v55  ;;  %1169 = vset.pattern.permute.xlu0 %v1313_v55  ;;  %v1236_v52 = vpop.eup %1235 }
 0x2db   :  { %879 = vperm.xlu1 %1157, %v1222_v39   ;;  %899 = vperm.xlu0 %1169, %v1228_v46  }
 0x2dd   :  { %v1238_v53 = vpop.eup %1237 }
 0x2df   :  { %1158 = vset.pattern.permute.xlu1 %v1314_v59  ;;  %1170 = vset.pattern.permute.xlu0 %v1314_v59 }
 0x2e0   :  { %704 = vperm.xlu1 %1158, %v1507_v14   ;;  %749 = vperm.xlu0 %1170, %v1232_v49   ;;  %v1244_v14 = vld [vmem:[#allocation3 + $0x8] sm:$0xff] }
 0x2e2   :  { %v1240_v54 = vpop.eup %1239 }
 0x2e4   :  { %719 = vperm.xlu1 %1158, %v1234_v51   ;;  %1173 = vset.pattern.permute.xlu0 %v1313_v55 }
 0x2e5   :  { %907 = vperm.xlu0 %1173, %v1236_v52  }
 0x2e8   :  { %1160 = vset.pattern.permute.xlu1 %v1313_v55 }
 0x2e9   :  { %887 = vperm.xlu1 %1160, %v1234_v51   ;;  %1174 = vset.pattern.permute.xlu0 %v1314_v59  ;;  %v1251_v51 = vld [vmem:[#allocation3 + $0x150] sm:$0xff] }
 0x2ea   :  { %759 = vperm.xlu0 %1174, %v1238_v53  }
 0x2ed   :  { %1161 = vset.pattern.permute.xlu1 %v1314_v59 }
 0x2ee   :  { %714 = vperm.xlu1 %1161, %v1512_v25   ;;  %1175 = vset.pattern.permute.xlu0 %v1313_v55 }
 0x2ef   :  { %915 = vperm.xlu0 %1175, %v1240_v54  }
 0x2f2   :  { %1163 = vset.pattern.permute.xlu1 %v1313_v55 }
 0x2f3   :  { %895 = vperm.xlu1 %1163, %v1516_v28   ;;  %v1246_v28 = vld [vmem:[#allocation3 + $0x28] sm:$0xff] }
 0x2f7   :  { %1164 = vset.pattern.permute.xlu1 %v1314_v59 }
 0x2f8   :  { %724 = vperm.xlu1 %1164, %v1216_v36  }
 0x2fc   :  { %1167 = vset.pattern.permute.xlu1 %v1313_v55 }
 0x2fd   :  { %903 = vperm.xlu1 %1167, %v1224_v40  }
 0x301   :  { %1168 = vset.pattern.permute.xlu1 %v1314_v59 }
 0x302   :  { %734 = vperm.xlu1 %1168, %v1228_v46  }
 0x306   :  { %1171 = vset.pattern.permute.xlu1 %v1313_v55 }
 0x307   :  { %911 = vperm.xlu1 %1171, %v1232_v49  }
 0x30b   :  { %1172 = vset.pattern.permute.xlu1 %v1314_v59 }
 0x30c   :  { %744 = vperm.xlu1 %1172, %v1236_v52  }
 0x310   :  { %754 = vperm.xlu1 %1172, %v1240_v54  }
 0x314   :  { %1176 = vset.pattern.permute.xlu1 %v1313_v55  ;;  %v1242_v55 = vld [vmem:[#allocation3 + $0x108] sm:$0xff] }
 0x315   :  { %919 = vperm.xlu1 %1176, %v1238_v53   ;;  %v1252_v53 = vld [vmem:[#allocation3 + $0x158] sm:$0xff] }
 0x337   :  { %v864_v60 = vpop.permute.xlu0 %863  ;;  %v690_v61 = vpop.permute.xlu1 %689 }
 0x338   :  { %v924_v62 = vmul.f32 %v864_v60, %v1351_v5  ;;  %v925_v63 = vmul.f32 %v864_v60, %v1353_v6  ;;  %v764_v0 = vmul.f32 %v690_v61, %v1355_v8  ;;  %v765_v1 = vmul.f32 %v690_v61, %v1357_v9 }
 0x33a   :  { %957 = vst [vmem:[#allocation6 + $0x110] sm:$0xff] %v924_v62  ;;  %958 = vst [vmem:[#allocation6 + $0x118] sm:$0xff] %v925_v63  ;;  %v676_v62 = vld [vmem:[#allocation3 + $0xd0] sm:$0xff]  ;;  %v677_v63 = vld [vmem:[#allocation3 + $0xd8] sm:$0xff] }
 0x33b   :  { %796 = vst [vmem:[#allocation6 + $0x10] sm:$0xff] %v764_v0  ;;  %797 = vst [vmem:[#allocation6 + $0x18] sm:$0xff] %v765_v1 }
 0x33c   :  { %v860_v59 = vpop.permute.xlu1 %859  ;;  %v685_v2 = vpop.permute.xlu0 %684 }
 0x33d   :  { %v922_v4 = vmul.f32 %v1241_v3, %v860_v59  ;;  %v923_v7 = vmul.f32 %v1242_v55, %v860_v59  ;;  %v762_v11 = vmul.f32 %v1243_v10, %v685_v2  ;;  %v763_v5 = vmul.f32 %v1244_v14, %v685_v2  ;;  %v1253_v59 = vld [vmem:[#allocation3 + $0x40] sm:$0xff]  ;;  %v1254_v3 = vld [vmem:[#allocation3 + $0x48] sm:$0xff] }
 0x33e   :  { %v850_v10 = vld [vmem:[#allocation3 + $0x1c0] sm:$0xff] }
 0x33f   :  { %955 = vst [vmem:[#allocation6 + $0x100] sm:$0xff] %v922_v4  ;;  %956 = vst [vmem:[#allocation6 + $0x108] sm:$0xff] %v923_v7 }
 0x340   :  { %794 = vst [vmem:[#allocation6] sm:$0xff] %v762_v11  ;;  %795 = vst [vmem:[#allocation6 + $0x8] sm:$0xff] %v763_v5  ;;  %v851_v11 = vld [vmem:[#allocation3 + $0x1c8] sm:$0xff]  ;;  %v1255_v5 = vld [vmem:[#allocation3 + $0x70] sm:$0xff] }
 0x341   :  { %v700_v6 = vpop.permute.xlu1 %699  ;;  %v876_v8 = vpop.permute.xlu0 %875 }
 0x342   :  { %v768_v9 = vmul.f32 %v700_v6, %v1363_v12  ;;  %v769_v15 = vmul.f32 %v700_v6, %v1365_v13  ;;  %v930_v16 = vmul.f32 %v876_v8, %v1375_v32  ;;  %v931_v20 = vmul.f32 %v876_v8, %v1377_v33  ;;  %v668_v13 = vld [vmem:[#allocation3 + $0x90] sm:$0xff]  ;;  %v669_v32 = vld [vmem:[#allocation3 + $0x98] sm:$0xff] }
 0x343   :  { %v1256_v8 = vld [vmem:[#allocation3 + $0x78] sm:$0xff] }
 0x344   :  { %800 = vst [vmem:[#allocation6 + $0x30] sm:$0xff] %v768_v9  ;;  %801 = vst [vmem:[#allocation6 + $0x38] sm:$0xff] %v769_v15 }
 0x345   :  { %963 = vst [vmem:[#allocation6 + $0x140] sm:$0xff] %v930_v16  ;;  %964 = vst [vmem:[#allocation6 + $0x148] sm:$0xff] %v931_v20 }
 0x346   :  { %v872_v21 = vpop.permute.xlu1 %871  ;;  %v884_v17 = vpop.permute.xlu0 %883 }
 0x347   :  { %v928_v22 = vmul.f32 %v872_v21, %v1369_v18  ;;  %v929_v23 = vmul.f32 %v872_v21, %v1371_v19  ;;  %v934_v24 = vmul.f32 %v884_v17, %v1381_v44  ;;  %v935_v12 = vmul.f32 %v884_v17, %v1383_v45  ;;  %v1247_v45 = vld [vmem:[#allocation3 + $0x120] sm:$0xff]  ;;  %v680_v21 = vld [vmem:[#allocation3 + $0xf0] sm:$0xff]  ;;  %v681_v17 = vld [vmem:[#allocation3 + $0xf8] sm:$0xff] }
 0x349   :  { %961 = vst [vmem:[#allocation6 + $0x130] sm:$0xff] %v928_v22  ;;  %962 = vst [vmem:[#allocation6 + $0x138] sm:$0xff] %v929_v23  ;;  %v1257_v23 = vld [vmem:[#allocation3 + $0x170] sm:$0xff] }
 0x34a   :  { %967 = vst [vmem:[#allocation6 + $0x160] sm:$0xff] %v934_v24  ;;  %968 = vst [vmem:[#allocation6 + $0x168] sm:$0xff] %v935_v12  ;;  %v1258_v12 = vld [vmem:[#allocation3 + $0x178] sm:$0xff] }
 0x34b   :  { %v695_v33 = vpop.permute.xlu1 %694  ;;  %v730_v25 = vpop.permute.xlu0 %729 }
 0x34c   :  { %v766_v27 = vmul.f32 %v1245_v26, %v695_v33  ;;  %v767_v29 = vmul.f32 %v1246_v28, %v695_v33  ;;  %v780_v30 = vmul.f32 %v730_v25, %v668_v13  ;;  %v781_v18 = vmul.f32 %v730_v25, %v669_v32  ;;  %v662_v26 = vld [vmem:[#allocation3 + $0x60] sm:$0xff] }
 0x34d   :  { %v854_v28 = vld [vmem:[#allocation3 + $0x1e0] sm:$0xff] }
 0x34e   :  { %798 = vst [vmem:[#allocation6 + $0x20] sm:$0xff] %v766_v27  ;;  %799 = vst [vmem:[#allocation6 + $0x28] sm:$0xff] %v767_v29  ;;  %v663_v27 = vld [vmem:[#allocation3 + $0x68] sm:$0xff] }
 0x34f   :  { %812 = vst [vmem:[#allocation6 + $0x90] sm:$0xff] %v780_v30  ;;  %813 = vst [vmem:[#allocation6 + $0x98] sm:$0xff] %v781_v18  ;;  %v855_v29 = vld [vmem:[#allocation3 + $0x1e8] sm:$0xff] }
 0x350   :  { %v868_v19 = vpop.permute.xlu1 %867  ;;  %v892_v44 = vpop.permute.xlu0 %891 }
 0x351   :  { %v926_v31 = vmul.f32 %v1247_v45, %v868_v19  ;;  %v927_v35 = vmul.f32 %v1248_v34, %v868_v19  ;;  %v938_v36 = vmul.f32 %v892_v44, %v1387_v56  ;;  %v939_v37 = vmul.f32 %v892_v44, %v1389_v57  ;;  %v846_v56 = vld [vmem:[#allocation3 + $0x1a0] sm:$0xff]  ;;  %v847_v57 = vld [vmem:[#allocation3 + $0x1a8] sm:$0xff]  ;;  %v844_v34 = vld [vmem:[#allocation3 + $0x190] sm:$0xff] }
 0x353   :  { %959 = vst [vmem:[#allocation6 + $0x120] sm:$0xff] %v926_v31  ;;  %960 = vst [vmem:[#allocation6 + $0x128] sm:$0xff] %v927_v35  ;;  %v845_v35 = vld [vmem:[#allocation3 + $0x198] sm:$0xff] }
 0x354   :  { %971 = vst [vmem:[#allocation6 + $0x180] sm:$0xff] %v938_v36  ;;  %972 = vst [vmem:[#allocation6 + $0x188] sm:$0xff] %v939_v37 }
 0x355   :  { %v710_v39 = vpop.permute.xlu1 %709  ;;  %v740_v40 = vpop.permute.xlu0 %739 }
 0x356   :  { %v772_v42 = vmul.f32 %v1249_v41, %v710_v39  ;;  %v773_v46 = vmul.f32 %v1250_v43, %v710_v39  ;;  %v784_v47 = vmul.f32 %v740_v40, %v672_v38  ;;  %v785_v48 = vmul.f32 %v740_v40, %v673_v58  ;;  %v666_v58 = vld [vmem:[#allocation3 + $0x80] sm:$0xff]  ;;  %v667_v39 = vld [vmem:[#allocation3 + $0x88] sm:$0xff]  ;;  %v848_v43 = vld [vmem:[#allocation3 + $0x1b0] sm:$0xff] }
 0x358   :  { %804 = vst [vmem:[#allocation6 + $0x50] sm:$0xff] %v772_v42  ;;  %805 = vst [vmem:[#allocation6 + $0x58] sm:$0xff] %v773_v46  ;;  %v849_v46 = vld [vmem:[#allocation3 + $0x1b8] sm:$0xff] }
 0x359   :  { %816 = vst [vmem:[#allocation6 + $0xb0] sm:$0xff] %v784_v47  ;;  %817 = vst [vmem:[#allocation6 + $0xb8] sm:$0xff] %v785_v48 }
 0x35a   :  { %v880_v49 = vpop.permute.xlu1 %879  ;;  %v900_v50 = vpop.permute.xlu0 %899 }
 0x35b   :  { %v932_v52 = vmul.f32 %v1251_v51, %v880_v49  ;;  %v933_v54 = vmul.f32 %v1252_v53, %v880_v49  ;;  %v942_v60 = vmul.f32 %v900_v50, %v846_v56  ;;  %v943_v61 = vmul.f32 %v900_v50, %v847_v57  ;;  %v670_v57 = vld [vmem:[#allocation3 + $0xa0] sm:$0xff]  ;;  %v671_v49 = vld [vmem:[#allocation3 + $0xa8] sm:$0xff]  ;;  %v852_v53 = vld [vmem:[#allocation3 + $0x1d0] sm:$0xff] }
 0x35d   :  { %965 = vst [vmem:[#allocation6 + $0x150] sm:$0xff] %v932_v52  ;;  %966 = vst [vmem:[#allocation6 + $0x158] sm:$0xff] %v933_v54  ;;  %v853_v54 = vld [vmem:[#allocation3 + $0x1d8] sm:$0xff] }
 0x35e   :  { %975 = vst [vmem:[#allocation6 + $0x1a0] sm:$0xff] %v942_v60  ;;  %976 = vst [vmem:[#allocation6 + $0x1a8] sm:$0xff] %v943_v61 }
 0x35f   :  { %v705_v0 = vpop.permute.xlu1 %704  ;;  %v750_v1 = vpop.permute.xlu0 %749 }
 0x360   :  { %v770_v2 = vmul.f32 %v1253_v59, %v705_v0  ;;  %v771_v4 = vmul.f32 %v1254_v3, %v705_v0  ;;  %v788_v55 = vmul.f32 %v750_v1, %v676_v62  ;;  %v789_v7 = vmul.f32 %v750_v1, %v677_v63  ;;  %v674_v63 = vld [vmem:[#allocation3 + $0xc0] sm:$0xff]  ;;  %v675_v0 = vld [vmem:[#allocation3 + $0xc8] sm:$0xff] }
 0x361   :  { %v678_v3 = vld [vmem:[#allocation3 + $0xe0] sm:$0xff] }
 0x362   :  { %802 = vst [vmem:[#allocation6 + $0x40] sm:$0xff] %v770_v2  ;;  %803 = vst [vmem:[#allocation6 + $0x48] sm:$0xff] %v771_v4  ;;  %v679_v4 = vld [vmem:[#allocation3 + $0xe8] sm:$0xff] }
 0x363   :  { %820 = vst [vmem:[#allocation6 + $0xd0] sm:$0xff] %v788_v55  ;;  %821 = vst [vmem:[#allocation6 + $0xd8] sm:$0xff] %v789_v7  ;;  %v720_v14 = vpop.permute.xlu1 %719 }
 0x364   :  { %v776_v6 = vmul.f32 %v1255_v5, %v720_v14  ;;  %v777_v9 = vmul.f32 %v1256_v8, %v720_v14  ;;  %v908_v15 = vpop.permute.xlu0 %907  ;;  %v857_v14 = vld [vmem:[#allocation3 + $0x1f8] sm:$0xff] }
 0x365   :  { %v946_v16 = vmul.f32 %v908_v15, %v850_v10  ;;  %v947_v20 = vmul.f32 %v908_v15, %v851_v11  ;;  %v856_v11 = vld [vmem:[#allocation3 + $0x1f0] sm:$0xff] }
 0x366   :  { %808 = vst [vmem:[#allocation6 + $0x70] sm:$0xff] %v776_v6  ;;  %809 = vst [vmem:[#allocation6 + $0x78] sm:$0xff] %v777_v9 }
 0x367   :  { %979 = vst [vmem:[#allocation6 + $0x1c0] sm:$0xff] %v946_v16  ;;  %980 = vst [vmem:[#allocation6 + $0x1c8] sm:$0xff] %v947_v20 }
 0x368   :  { %v888_v22 = vpop.permute.xlu1 %887 }
 0x369   :  { %v936_v24 = vmul.f32 %v1257_v23, %v888_v22  ;;  %v937_v13 = vmul.f32 %v1258_v12, %v888_v22  ;;  %v760_v32 = vpop.permute.xlu0 %759 }
 0x36a   :  { %v792_v33 = vmul.f32 %v760_v32, %v680_v21  ;;  %v793_v25 = vmul.f32 %v760_v32, %v681_v17 }
 0x36b   :  { %969 = vst [vmem:[#allocation6 + $0x170] sm:$0xff] %v936_v24  ;;  %970 = vst [vmem:[#allocation6 + $0x178] sm:$0xff] %v937_v13 }
 0x36c   :  { %824 = vst [vmem:[#allocation6 + $0xf0] sm:$0xff] %v792_v33  ;;  %825 = vst [vmem:[#allocation6 + $0xf8] sm:$0xff] %v793_v25 }
 0x36d   :  { %v715_v30 = vpop.permute.xlu1 %714 }
 0x36e   :  { %v774_v18 = vmul.f32 %v715_v30, %v662_v26  ;;  %v775_v19 = vmul.f32 %v715_v30, %v663_v27  ;;  %v916_v44 = vpop.permute.xlu0 %915 }
 0x36f   :  { %v950_v45 = vmul.f32 %v916_v44, %v854_v28  ;;  %v951_v31 = vmul.f32 %v916_v44, %v855_v29 }
 0x370   :  { %806 = vst [vmem:[#allocation6 + $0x60] sm:$0xff] %v774_v18  ;;  %807 = vst [vmem:[#allocation6 + $0x68] sm:$0xff] %v775_v19 }
 0x371   :  { %983 = vst [vmem:[#allocation6 + $0x1e0] sm:$0xff] %v950_v45  ;;  %984 = vst [vmem:[#allocation6 + $0x1e8] sm:$0xff] %v951_v31 }
 0x372   :  { %v896_v36 = vpop.permute.xlu1 %895 }
 0x373   :  { %v940_v37 = vmul.f32 %v896_v36, %v844_v34  ;;  %v941_v38 = vmul.f32 %v896_v36, %v845_v35 }
 0x375   :  { %973 = vst [vmem:[#allocation6 + $0x190] sm:$0xff] %v940_v37  ;;  %974 = vst [vmem:[#allocation6 + $0x198] sm:$0xff] %v941_v38 }
 0x377   :  { %v725_v40 = vpop.permute.xlu1 %724 }
 0x378   :  { %v778_v41 = vmul.f32 %v725_v40, %v666_v58  ;;  %v779_v42 = vmul.f32 %v725_v40, %v667_v39 }
 0x37a   :  { %810 = vst [vmem:[#allocation6 + $0x80] sm:$0xff] %v778_v41  ;;  %811 = vst [vmem:[#allocation6 + $0x88] sm:$0xff] %v779_v42 }
 0x37c   :  { %v904_v47 = vpop.permute.xlu1 %903 }
 0x37d   :  { %v944_v48 = vmul.f32 %v904_v47, %v848_v43  ;;  %v945_v56 = vmul.f32 %v904_v47, %v849_v46 }
 0x37f   :  { %977 = vst [vmem:[#allocation6 + $0x1b0] sm:$0xff] %v944_v48  ;;  %978 = vst [vmem:[#allocation6 + $0x1b8] sm:$0xff] %v945_v56 }
 0x381   :  { %v735_v50 = vpop.permute.xlu1 %734 }
 0x382   :  { %v782_v51 = vmul.f32 %v735_v50, %v670_v57  ;;  %v783_v52 = vmul.f32 %v735_v50, %v671_v49 }
 0x384   :  { %814 = vst [vmem:[#allocation6 + $0xa0] sm:$0xff] %v782_v51  ;;  %815 = vst [vmem:[#allocation6 + $0xa8] sm:$0xff] %v783_v52 }
 0x386   :  { %v912_v60 = vpop.permute.xlu1 %911 }
 0x387   :  { %v948_v61 = vmul.f32 %v912_v60, %v852_v53  ;;  %v949_v62 = vmul.f32 %v912_v60, %v853_v54 }
 0x389   :  { %981 = vst [vmem:[#allocation6 + $0x1d0] sm:$0xff] %v948_v61  ;;  %982 = vst [vmem:[#allocation6 + $0x1d8] sm:$0xff] %v949_v62 }
 0x38b   :  { %v745_v1 = vpop.permute.xlu1 %744 }
 0x38c   :  { %v786_v59 = vmul.f32 %v745_v1, %v674_v63  ;;  %v787_v2 = vmul.f32 %v745_v1, %v675_v0 }
 0x38e   :  { %818 = vst [vmem:[#allocation6 + $0xc0] sm:$0xff] %v786_v59  ;;  %819 = vst [vmem:[#allocation6 + $0xc8] sm:$0xff] %v787_v2 }
 0x38f   :  { %v755_v55 = vpop.permute.xlu1 %754 }
 0x390   :  { %v790_v7 = vmul.f32 %v755_v55, %v678_v3  ;;  %v791_v10 = vmul.f32 %v755_v55, %v679_v4 }
 0x392   :  { %822 = vst [vmem:[#allocation6 + $0xe0] sm:$0xff] %v790_v7  ;;  %823 = vst [vmem:[#allocation6 + $0xe8] sm:$0xff] %v791_v10 }
 0x394   :  { %v920_v5 = vpop.permute.xlu1 %919 }
 0x395   :  { %v952_v6 = vmul.f32 %v920_v5, %v856_v11  ;;  %v953_v8 = vmul.f32 %v920_v5, %v857_v14 }
 0x397   :  { %985 = vst [vmem:[#allocation6 + $0x1f0] sm:$0xff] %v952_v6  ;;  %986 = vst [vmem:[#allocation6 + $0x1f8] sm:$0xff] %v953_v8 }
 0x398   :  { %1292 = shalt.err (!%p1289_p12)
}
 0x399   :  { %s1293_s8 = scalar_lea.hbm %s1576_s3, 8192 }
 0x39a   :  { %p1294_p13 = scmp.ne.s32.totalorder %s1576_s3, %s1293_s8  ;;  %p1297_p0 = scmp.lt.u32.totalorder %s1293_s8, %s1576_s3 }
 0x39c   :  { %p1299_p1 = pnand %p1297_p0, %p1294_p13 }
 0x39e   :  { %1302 = shalt.err (!%p1299_p1)
}
 0x39f   :  { %998 = dma.vmem_to_hbm [thread:$0]  %s993_s5, 8192, %s1576_s3, [#allocation5], %s1308_s22, %s1308_s22, %s1309_s23  }
 0x3a0   :  { %1305 = dma.done.wait [#allocation5], 8192  }
 0x3a1   :  { %1306 = vsyncadd [#allocation5], 4294959104 }
 0x3a2   :  { %1002 = vsyncpa [#allocation4], 1 }
 0x3a3   :  { %1003 = vsyncpa [#allocation5], 1 }

</bundles_post_ra>
